<compile_context>
chip_gen: v7x
topology: tpu7x:2x2x1
jax: 0.10.0
libtpu: 0.0.40
codegen_flags: <defaults>
</compile_context>

<pallas_src>
import jax
import jax.numpy as jnp
from jax.experimental import pallas as pl
from jax.experimental.pallas import tpu as pltpu

LANE = 128
SUBLANE = 16  # bf16 sublane packing


def _round_up(x, m):
    return (x + m - 1) // m * m


# ----------------------------------------------------------------------------
# Kernel body: one batch tile through all three layers (weights VMEM-resident).
# ----------------------------------------------------------------------------
def mlp_kernel(x_ref, w1_ref, b1_ref, w2_ref, b2_ref, w3_ref, b3_ref, o_ref):
    # x arrives f32; cast to bf16 in-kernel (one 4B HBM read instead of a
    # separate XLA cast pass of 4B read + 2B write + 2B read).
    x = x_ref[...].astype(jnp.bfloat16)

    # Layer 1: bf16 MXU matmul, f32 accumulation; bias + ReLU in f32.
    h1 = jnp.dot(x, w1_ref[...], preferred_element_type=jnp.float32)
    h1 = jnp.maximum(h1 + b1_ref[...], 0.0)

    # Layer 2.
    h2 = jnp.dot(h1.astype(jnp.bfloat16), w2_ref[...],
                 preferred_element_type=jnp.float32)
    h2 = jnp.maximum(h2 + b2_ref[...], 0.0)

    # Layer 3 (output columns padded to a multiple of 128 -> lane-dense store).
    out = jnp.dot(h2.astype(jnp.bfloat16), w3_ref[...],
                  preferred_element_type=jnp.float32)
    o_ref[...] = (out + b3_ref[...]).astype(o_ref.dtype)


# ----------------------------------------------------------------------------
# One-time parameter preprocessing (do NOT call this per forward step).
# ----------------------------------------------------------------------------
def prepare_params(params):
    """Pad w3/b3 to a lane multiple and cast weights to bf16, once."""
    w1, b1 = params["w1"], params["b1"]
    w2, b2 = params["w2"], params["b2"]
    w3, b3 = params["w3"], params["b3"]

    n_output = int(w3.shape[1])
    n_out_pad = _round_up(n_output, LANE)
    if n_out_pad != n_output:
        w3 = jnp.pad(w3, ((0, 0), (0, n_out_pad - n_output)))
        b3 = jnp.pad(b3, ((0, 0), (0, n_out_pad - n_output)))

    return {
        "w1": w1.astype(jnp.bfloat16), "b1": b1.astype(jnp.float32),
        "w2": w2.astype(jnp.bfloat16), "b2": b2.astype(jnp.float32),
        "w3": w3.astype(jnp.bfloat16), "b3": b3.astype(jnp.float32),
        "n_output": n_output,  # python int (static)
    }


def _vmem_limit_bytes(tile_b, n_input, n_hidden, n_out_pad):
    """Working-set estimate: single-buffered weights + double-buffered I/O
    tiles + f32 intermediates, with generous headroom.  Clamped to a range
    that is legal on all generations (>=16 MiB default, <=64 MiB v7x)."""
    bf, f32 = 2, 4
    weights = (n_input * n_hidden + n_hidden * n_hidden
               + n_hidden * n_out_pad) * bf
    biases = (2 * n_hidden + n_out_pad) * f32
    x_io = 2 * tile_b * n_input * f32
    out_io = 2 * tile_b * n_out_pad * f32
    act = tile_b * (2 * n_hidden + n_out_pad) * f32
    est = int(1.5 * (weights + biases + x_io + out_io + act)) + (1 << 20)
    return min(max(est, 16 << 20), 64 << 20)


def _build_call(tile_b, grid, n_input, n_hidden, n_out_pad, batch_pad,
                single_buffer_weights):
    pipeline_mode = pl.Buffered(1) if single_buffer_weights else None

    def const(shape):  # VMEM-resident block (constant index map)
        return pl.BlockSpec(shape, lambda i: (0, 0), pipeline_mode=pipeline_mode)

    return pl.pallas_call(
        mlp_kernel,
        out_shape=jax.ShapeDtypeStruct((batch_pad, n_out_pad), jnp.float32),
        grid_spec=pl.GridSpec(
            grid=grid,
            in_specs=[
                pl.BlockSpec((tile_b, n_input), lambda i: (i, 0)),  # x tile
                const((n_input, n_hidden)),    # w1
                const((1, n_hidden)),          # b1
                const((n_hidden, n_hidden)),   # w2
                const((1, n_hidden)),          # b2
                const((n_hidden, n_out_pad)),  # w3 (padded)
                const((1, n_out_pad)),         # b3 (padded)
            ],
            out_specs=pl.BlockSpec((tile_b, n_out_pad), lambda i: (i, 0)),
        ),
        compiler_params=pltpu.CompilerParams(
            dimension_semantics=("parallel",),  # batch axis -> v7x dual-TC
            vmem_limit_bytes=_vmem_limit_bytes(tile_b, n_input, n_hidden,
                                               n_out_pad),
        ),
    )


# ----------------------------------------------------------------------------
# Forward pass.
# ----------------------------------------------------------------------------
def net_forward(x, prepped, *, tile_b_max=512):
    """Fused 3-layer MLP forward.

    x:       [batch, n_input] float32
    prepped: output of prepare_params()
    returns  [batch, n_output] float32 logits (no activation — matches PyTorch)
    """
    w1, b1 = prepped["w1"], prepped["b1"]
    w2, b2 = prepped["w2"], prepped["b2"]
    w3, b3 = prepped["w3"], prepped["b3"]
    n_output = prepped["n_output"]

    batch, n_input = x.shape
    n_hidden = w1.shape[1]
    n_out_pad = w3.shape[1]

    # Tile selection: >=2 grid tiles when possible (so the parallel batch axis
    # can shard across both v7x TensorCores), rows a multiple of 16 sublanes,
    # and minimal batch padding (pad < one sublane group).
    n_tiles = max(2, pl.cdiv(batch, tile_b_max))
    tile_b = min(_round_up(pl.cdiv(batch, n_tiles), SUBLANE),
                 _round_up(tile_b_max, SUBLANE))
    batch_pad = _round_up(batch, tile_b)
    if batch_pad != batch:
        x = jnp.pad(x, ((0, batch_pad - batch), (0, 0)))
    grid = (batch_pad // tile_b,)

    args = (x, w1, b1, w2, b2, w3, b3)
    try:
        out = _build_call(tile_b, grid, n_input, n_hidden, n_out_pad,
                          batch_pad, single_buffer_weights=True)(*args)
    except Exception:
        # Older JAX without pipeline_mode support: default double buffering.
        out = _build_call(tile_b, grid, n_input, n_hidden, n_out_pad,
                          batch_pad, single_buffer_weights=False)(*args)

    # NOTE: the padded f32 slab + slice is the largest remaining HBM stream;
    # a bf16 output (or fusing the downstream consumer) would halve it.
    return out[:batch, :n_output]


def init_params(key, n_input, n_hidden, n_output):
    """Deterministic init mimicking nn.Linear's uniform(-1/sqrt(fan_in), +)."""
    ks = jax.random.split(key, 6)

    def linear(kw, kb, fan_in, fan_out):
        bound = 1.0 / jnp.sqrt(jnp.float32(fan_in))
        # Stored already transposed: [fan_in, fan_out] (== torch W.T)
        w = jax.random.uniform(kw, (fan_in, fan_out), jnp.float32, -bound, bound)
        b = jax.random.uniform(kb, (1, fan_out), jnp.float32, -bound, bound)
        return w, b

    w1, b1 = linear(ks[0], ks[1], n_input, n_hidden)
    w2, b2 = linear(ks[2], ks[3], n_hidden, n_hidden)
    w3, b3 = linear(ks[4], ks[5], n_hidden, n_output)
    return {"w1": w1, "b1": b1, "w2": w2, "b2": b2, "w3": w3, "b3": b3}


if __name__ == "__main__":
    # Module-consistent shapes: flattened image features -> hidden -> classes.
    batch = 256       # 2 batch tiles of 128 -> exercises the parallel grid
    n_input = 32      # image.shape[0] stand-in
    n_hidden = 128
    n_output = 10     # number of distinct labels stand-in

    key = jax.random.PRNGKey(0)
    k_x, k_p = jax.random.split(key)

    x = jax.random.normal(k_x, (batch, n_input), jnp.float32)
    params = init_params(k_p, n_input, n_hidden, n_output)

    # One-time preprocessing (bf16 cast + lane padding), outside the hot path.
    prepped = prepare_params(params)

    out = net_forward(x, prepped, tile_b_max=512)
    out = jax.block_until_ready(out)

    # Pure-JAX reference with the same bf16-operand / f32-accumulate recipe.
    # (Intentional precision decision: bf16 MXU operands give ~1e-2 relative
    # error vs. PyTorch's f32 nn.Linear.)
    def ref(x, p):
        bf = lambda a: a.astype(jnp.bfloat16)
        h1 = jnp.maximum(
            jnp.dot(bf(x), bf(p["w1"]), preferred_element_type=jnp.float32)
            + p["b1"], 0.0)
        h2 = jnp.maximum(
            jnp.dot(bf(h1), bf(p["w2"]), preferred_element_type=jnp.float32)
            + p["b2"], 0.0)
        return (jnp.dot(bf(h2), bf(p["w3"]), preferred_element_type=jnp.float32)
                + p["b3"])

    expected = ref(x, params)
    assert out.shape == (batch, n_output)
    assert jnp.allclose(out, expected, atol=1e-2, rtol=1e-2), (
        float(jnp.max(jnp.abs(out - expected))))

    print("KERNEL_OK")
</pallas_src>

<mosaic_0001>
module attributes {stable_mosaic.version = 11 : i64} {
  func.func @mlp_kernel(%arg0: i32, %arg1: memref<128x32xf32, #tpu.memory_space<vmem>>, %arg2: memref<32x128xbf16, #tpu.memory_space<vmem>>, %arg3: memref<1x128xf32, #tpu.memory_space<vmem>>, %arg4: memref<128x128xbf16, #tpu.memory_space<vmem>>, %arg5: memref<1x128xf32, #tpu.memory_space<vmem>>, %arg6: memref<128x128xbf16, #tpu.memory_space<vmem>>, %arg7: memref<1x128xf32, #tpu.memory_space<vmem>>, %arg8: memref<128x128xf32, #tpu.memory_space<vmem>>) attributes {dimension_semantics = [#tpu.dimension_semantics<parallel>], iteration_bounds = array<i64: 2>, scalar_prefetch = 0 : i64, scratch_operands = 0 : i64, tpu.core_type = #tpu.core_type<tc>, window_params = [{transform_indices = @transform_0, window_bounds = array<i64: 128, 32>}, {pipeline_mode = #tpu.pipeline_mode<synchronous>, transform_indices = @transform_1, window_bounds = array<i64: 32, 128>}, {pipeline_mode = #tpu.pipeline_mode<synchronous>, transform_indices = @transform_2, window_bounds = array<i64: 1, 128>}, {pipeline_mode = #tpu.pipeline_mode<synchronous>, transform_indices = @transform_3, window_bounds = array<i64: 128, 128>}, {pipeline_mode = #tpu.pipeline_mode<synchronous>, transform_indices = @transform_4, window_bounds = array<i64: 1, 128>}, {pipeline_mode = #tpu.pipeline_mode<synchronous>, transform_indices = @transform_5, window_bounds = array<i64: 128, 128>}, {pipeline_mode = #tpu.pipeline_mode<synchronous>, transform_indices = @transform_6, window_bounds = array<i64: 1, 128>}, {transform_indices = @transform_7, window_bounds = array<i64: 128, 128>}]} {
    %c0 = arith.constant 0 : index
    %c0_0 = arith.constant 0 : index
    %0 = vector.load %arg1[%c0, %c0_0] : memref<128x32xf32, #tpu.memory_space<vmem>>, vector<128x32xf32>
    %1 = arith.truncf %0 : vector<128x32xf32> to vector<128x32xbf16>
    %c0_1 = arith.constant 0 : index
    %c0_2 = arith.constant 0 : index
    %2 = vector.load %arg2[%c0_1, %c0_2] : memref<32x128xbf16, #tpu.memory_space<vmem>>, vector<32x128xbf16>
    %cst = arith.constant dense<0.000000e+00> : vector<128x128xf32>
    %3 = tpu.matmul %1, %2, %cst {dimension_numbers = #tpu.dot_dimension_numbers<[1], [0], [0], [1], [0, 0, 1, 1], [], []>} : vector<128x32xbf16>, vector<32x128xbf16>, vector<128x128xf32> -> vector<128x128xf32>
    %c0_3 = arith.constant 0 : index
    %c0_4 = arith.constant 0 : index
    %4 = vector.load %arg3[%c0_3, %c0_4] : memref<1x128xf32, #tpu.memory_space<vmem>>, vector<1x128xf32>
    %5 = vector.broadcast %4 : vector<1x128xf32> to vector<128x128xf32>
    %6 = arith.addf %3, %5 : vector<128x128xf32>
    %cst_5 = arith.constant 0.000000e+00 : f32
    %7 = vector.broadcast %cst_5 : f32 to vector<128x128xf32>
    %8 = arith.maximumf %6, %7 : vector<128x128xf32>
    %9 = arith.truncf %8 : vector<128x128xf32> to vector<128x128xbf16>
    %c0_6 = arith.constant 0 : index
    %c0_7 = arith.constant 0 : index
    %10 = vector.load %arg4[%c0_6, %c0_7] : memref<128x128xbf16, #tpu.memory_space<vmem>>, vector<128x128xbf16>
    %cst_8 = arith.constant dense<0.000000e+00> : vector<128x128xf32>
    %11 = tpu.matmul %9, %10, %cst_8 {dimension_numbers = #tpu.dot_dimension_numbers<[1], [0], [0], [1], [0, 0, 1, 1], [], []>} : vector<128x128xbf16>, vector<128x128xbf16>, vector<128x128xf32> -> vector<128x128xf32>
    %c0_9 = arith.constant 0 : index
    %c0_10 = arith.constant 0 : index
    %12 = vector.load %arg5[%c0_9, %c0_10] : memref<1x128xf32, #tpu.memory_space<vmem>>, vector<1x128xf32>
    %13 = vector.broadcast %12 : vector<1x128xf32> to vector<128x128xf32>
    %14 = arith.addf %11, %13 : vector<128x128xf32>
    %cst_11 = arith.constant 0.000000e+00 : f32
    %15 = vector.broadcast %cst_11 : f32 to vector<128x128xf32>
    %16 = arith.maximumf %14, %15 : vector<128x128xf32>
    %17 = arith.truncf %16 : vector<128x128xf32> to vector<128x128xbf16>
    %c0_12 = arith.constant 0 : index
    %c0_13 = arith.constant 0 : index
    %18 = vector.load %arg6[%c0_12, %c0_13] : memref<128x128xbf16, #tpu.memory_space<vmem>>, vector<128x128xbf16>
    %cst_14 = arith.constant dense<0.000000e+00> : vector<128x128xf32>
    %19 = tpu.matmul %17, %18, %cst_14 {dimension_numbers = #tpu.dot_dimension_numbers<[1], [0], [0], [1], [0, 0, 1, 1], [], []>} : vector<128x128xbf16>, vector<128x128xbf16>, vector<128x128xf32> -> vector<128x128xf32>
    %c0_15 = arith.constant 0 : index
    %c0_16 = arith.constant 0 : index
    %20 = vector.load %arg7[%c0_15, %c0_16] : memref<1x128xf32, #tpu.memory_space<vmem>>, vector<1x128xf32>
    %21 = vector.broadcast %20 : vector<1x128xf32> to vector<128x128xf32>
    %22 = arith.addf %19, %21 : vector<128x128xf32>
    %c0_17 = arith.constant 0 : index
    %c0_18 = arith.constant 0 : index
    %23 = vector.load %arg8[%c0_17, %c0_18] : memref<128x128xf32, #tpu.memory_space<vmem>>, vector<128x128xf32>
    tpu.vector_store %arg8[%c0_17, %c0_18], %22 {strides = array<i32>} : memref<128x128xf32, #tpu.memory_space<vmem>>, vector<128x128xf32>,
    return
  }
  func.func @transform_0(%arg0: i32) -> (i32, i32) {
    %c0_i32 = arith.constant 0 : i32
    %c0_i32_0 = arith.constant 0 : i32
    return %arg0, %c0_i32 : i32, i32
  }
  func.func @transform_1(%arg0: i32) -> (i32, i32) {
    %c0_i32 = arith.constant 0 : i32
    %c0_i32_0 = arith.constant 0 : i32
    %c0_i32_1 = arith.constant 0 : i32
    return %c0_i32, %c0_i32_0 : i32, i32
  }
  func.func @transform_2(%arg0: i32) -> (i32, i32) {
    %c0_i32 = arith.constant 0 : i32
    %c0_i32_0 = arith.constant 0 : i32
    %c0_i32_1 = arith.constant 0 : i32
    return %c0_i32, %c0_i32_0 : i32, i32
  }
  func.func @transform_3(%arg0: i32) -> (i32, i32) {
    %c0_i32 = arith.constant 0 : i32
    %c0_i32_0 = arith.constant 0 : i32
    %c0_i32_1 = arith.constant 0 : i32
    return %c0_i32, %c0_i32_0 : i32, i32
  }
  func.func @transform_4(%arg0: i32) -> (i32, i32) {
    %c0_i32 = arith.constant 0 : i32
    %c0_i32_0 = arith.constant 0 : i32
    %c0_i32_1 = arith.constant 0 : i32
    return %c0_i32, %c0_i32_0 : i32, i32
  }
  func.func @transform_5(%arg0: i32) -> (i32, i32) {
    %c0_i32 = arith.constant 0 : i32
    %c0_i32_0 = arith.constant 0 : i32
    %c0_i32_1 = arith.constant 0 : i32
    return %c0_i32, %c0_i32_0 : i32, i32
  }
  func.func @transform_6(%arg0: i32) -> (i32, i32) {
    %c0_i32 = arith.constant 0 : i32
    %c0_i32_0 = arith.constant 0 : i32
    %c0_i32_1 = arith.constant 0 : i32
    return %c0_i32, %c0_i32_0 : i32, i32
  }
  func.func @transform_7(%arg0: i32) -> (i32, i32) {
    %c0_i32 = arith.constant 0 : i32
    %c0_i32_0 = arith.constant 0 : i32
    return %arg0, %c0_i32 : i32, i32
  }
}

module attributes {stable_mosaic.version = 11 : i64} {
  func.func @mlp_kernel(%arg0: i32, %arg1: memref<128x32xf32, #tpu.memory_space<vmem>>, %arg2: memref<32x128xbf16, #tpu.memory_space<vmem>>, %arg3: memref<1x128xf32, #tpu.memory_space<vmem>>, %arg4: memref<128x128xbf16, #tpu.memory_space<vmem>>, %arg5: memref<1x128xf32, #tpu.memory_space<vmem>>, %arg6: memref<128x128xbf16, #tpu.memory_space<vmem>>, %arg7: memref<1x128xf32, #tpu.memory_space<vmem>>, %arg8: memref<128x128xf32, #tpu.memory_space<vmem>>) attributes {dimension_semantics = [#tpu.dimension_semantics<parallel>], iteration_bounds = array<i64: 2>, scalar_prefetch = 0 : i64, scratch_operands = 0 : i64, tpu.core_type = #tpu.core_type<tc>, window_params = [{transform_indices = @transform_0, window_bounds = array<i64: 128, 32>}, {pipeline_mode = #tpu.pipeline_mode<synchronous>, transform_indices = @transform_1, window_bounds = array<i64: 32, 128>}, {pipeline_mode = #tpu.pipeline_mode<synchronous>, transform_indices = @transform_2, window_bounds = array<i64: 1, 128>}, {pipeline_mode = #tpu.pipeline_mode<synchronous>, transform_indices = @transform_3, window_bounds = array<i64: 128, 128>}, {pipeline_mode = #tpu.pipeline_mode<synchronous>, transform_indices = @transform_4, window_bounds = array<i64: 1, 128>}, {pipeline_mode = #tpu.pipeline_mode<synchronous>, transform_indices = @transform_5, window_bounds = array<i64: 128, 128>}, {pipeline_mode = #tpu.pipeline_mode<synchronous>, transform_indices = @transform_6, window_bounds = array<i64: 1, 128>}, {transform_indices = @transform_7, window_bounds = array<i64: 128, 128>}]} {
    %c0 = arith.constant 0 : index
    %c0_0 = arith.constant 0 : index
    %0 = vector.load %arg1[%c0, %c0_0] : memref<128x32xf32, #tpu.memory_space<vmem>>, vector<128x32xf32>
    %1 = arith.truncf %0 : vector<128x32xf32> to vector<128x32xbf16>
    %c0_1 = arith.constant 0 : index
    %c0_2 = arith.constant 0 : index
    %2 = vector.load %arg2[%c0_1, %c0_2] : memref<32x128xbf16, #tpu.memory_space<vmem>>, vector<32x128xbf16>
    %cst = arith.constant dense<0.000000e+00> : vector<128x128xf32>
    %3 = tpu.matmul %1, %2, %cst {dimension_numbers = #tpu.dot_dimension_numbers<[1], [0], [0], [1], [0, 0, 1, 1], [], []>} : vector<128x32xbf16>, vector<32x128xbf16>, vector<128x128xf32> -> vector<128x128xf32>
    %c0_3 = arith.constant 0 : index
    %c0_4 = arith.constant 0 : index
    %4 = vector.load %arg3[%c0_3, %c0_4] : memref<1x128xf32, #tpu.memory_space<vmem>>, vector<1x128xf32>
    %5 = vector.broadcast %4 : vector<1x128xf32> to vector<128x128xf32>
    %6 = arith.addf %3, %5 : vector<128x128xf32>
    %cst_5 = arith.constant 0.000000e+00 : f32
    %7 = vector.broadcast %cst_5 : f32 to vector<128x128xf32>
    %8 = arith.maximumf %6, %7 : vector<128x128xf32>
    %9 = arith.truncf %8 : vector<128x128xf32> to vector<128x128xbf16>
    %c0_6 = arith.constant 0 : index
    %c0_7 = arith.constant 0 : index
    %10 = vector.load %arg4[%c0_6, %c0_7] : memref<128x128xbf16, #tpu.memory_space<vmem>>, vector<128x128xbf16>
    %cst_8 = arith.constant dense<0.000000e+00> : vector<128x128xf32>
    %11 = tpu.matmul %9, %10, %cst_8 {dimension_numbers = #tpu.dot_dimension_numbers<[1], [0], [0], [1], [0, 0, 1, 1], [], []>} : vector<128x128xbf16>, vector<128x128xbf16>, vector<128x128xf32> -> vector<128x128xf32>
    %c0_9 = arith.constant 0 : index
    %c0_10 = arith.constant 0 : index
    %12 = vector.load %arg5[%c0_9, %c0_10] : memref<1x128xf32, #tpu.memory_space<vmem>>, vector<1x128xf32>
    %13 = vector.broadcast %12 : vector<1x128xf32> to vector<128x128xf32>
    %14 = arith.addf %11, %13 : vector<128x128xf32>
    %cst_11 = arith.constant 0.000000e+00 : f32
    %15 = vector.broadcast %cst_11 : f32 to vector<128x128xf32>
    %16 = arith.maximumf %14, %15 : vector<128x128xf32>
    %17 = arith.truncf %16 : vector<128x128xf32> to vector<128x128xbf16>
    %c0_12 = arith.constant 0 : index
    %c0_13 = arith.constant 0 : index
    %18 = vector.load %arg6[%c0_12, %c0_13] : memref<128x128xbf16, #tpu.memory_space<vmem>>, vector<128x128xbf16>
    %cst_14 = arith.constant dense<0.000000e+00> : vector<128x128xf32>
    %19 = tpu.matmul %17, %18, %cst_14 {dimension_numbers = #tpu.dot_dimension_numbers<[1], [0], [0], [1], [0, 0, 1, 1], [], []>} : vector<128x128xbf16>, vector<128x128xbf16>, vector<128x128xf32> -> vector<128x128xf32>
    %c0_15 = arith.constant 0 : index
    %c0_16 = arith.constant 0 : index
    %20 = vector.load %arg7[%c0_15, %c0_16] : memref<1x128xf32, #tpu.memory_space<vmem>>, vector<1x128xf32>
    %21 = vector.broadcast %20 : vector<1x128xf32> to vector<128x128xf32>
    %22 = arith.addf %19, %21 : vector<128x128xf32>
    %c0_17 = arith.constant 0 : index
    %c0_18 = arith.constant 0 : index
    %23 = vector.load %arg8[%c0_17, %c0_18] : memref<128x128xf32, #tpu.memory_space<vmem>>, vector<128x128xf32>
    tpu.vector_store %arg8[%c0_17, %c0_18], %22 {strides = array<i32>} : memref<128x128xf32, #tpu.memory_space<vmem>>, vector<128x128xf32>,
    return
  }
  func.func @transform_0(%arg0: i32) -> (i32, i32) {
    %c0_i32 = arith.constant 0 : i32
    %c0_i32_0 = arith.constant 0 : i32
    return %arg0, %c0_i32 : i32, i32
  }
  func.func @transform_1(%arg0: i32) -> (i32, i32) {
    %c0_i32 = arith.constant 0 : i32
    %c0_i32_0 = arith.constant 0 : i32
    %c0_i32_1 = arith.constant 0 : i32
    return %c0_i32, %c0_i32_0 : i32, i32
  }
  func.func @transform_2(%arg0: i32) -> (i32, i32) {
    %c0_i32 = arith.constant 0 : i32
    %c0_i32_0 = arith.constant 0 : i32
    %c0_i32_1 = arith.constant 0 : i32
    return %c0_i32, %c0_i32_0 : i32, i32
  }
  func.func @transform_3(%arg0: i32) -> (i32, i32) {
    %c0_i32 = arith.constant 0 : i32
    %c0_i32_0 = arith.constant 0 : i32
    %c0_i32_1 = arith.constant 0 : i32
    return %c0_i32, %c0_i32_0 : i32, i32
  }
  func.func @transform_4(%arg0: i32) -> (i32, i32) {
    %c0_i32 = arith.constant 0 : i32
    %c0_i32_0 = arith.constant 0 : i32
    %c0_i32_1 = arith.constant 0 : i32
    return %c0_i32, %c0_i32_0 : i32, i32
  }
  func.func @transform_5(%arg0: i32) -> (i32, i32) {
    %c0_i32 = arith.constant 0 : i32
    %c0_i32_0 = arith.constant 0 : i32
    %c0_i32_1 = arith.constant 0 : i32
    return %c0_i32, %c0_i32_0 : i32, i32
  }
  func.func @transform_6(%arg0: i32) -> (i32, i32) {
    %c0_i32 = arith.constant 0 : i32
    %c0_i32_0 = arith.constant 0 : i32
    %c0_i32_1 = arith.constant 0 : i32
    return %c0_i32, %c0_i32_0 : i32, i32
  }
  func.func @transform_7(%arg0: i32) -> (i32, i32) {
    %c0_i32 = arith.constant 0 : i32
    %c0_i32_0 = arith.constant 0 : i32
    return %arg0, %c0_i32 : i32, i32
  }
}

</mosaic_0001>

<bundles_post_ra>
// kernel: tpu_custom_call.1
= control target key start
LH: loop header
LB: loop body
LE: loop exit
PB: predicated region body
PF: predicated region fallthrough
CT: control target
= control target key end

     0   :  { %12 = vsyncpa [#allocation3], 0  ;;  %s1474_s0 = inlined_call_operand.vmem [shape: f32[256,32], index: 0, kind: input, shape index: {}]   ;;  %s1475_s1 = inlined_call_operand.vmem [shape: bf16[32,128], index: 1, kind: input, shape index: {}]   ;;  %s1476_s2 = inlined_call_operand.vmem [shape: f32[1,128], index: 2, kind: input, shape index: {}]   ;;  %s1477_s3 = inlined_call_operand.vmem [shape: bf16[128,128], index: 3, kind: input, shape index: {}]   ;;  %s1478_s4 = inlined_call_operand.vmem [shape: f32[1,128], index: 4, kind: input, shape index: {}]   ;;  %s1479_s5 = inlined_call_operand.vmem [shape: bf16[128,128], index: 5, kind: input, shape index: {}]   ;;  %s1480_s6 = inlined_call_operand.vmem [shape: f32[1,128], index: 6, kind: input, shape index: {}]   ;;  %s1481_s7 = inlined_call_operand.hbm [shape: f32[256,128], index: 7, kind: output, shape index: {}]  }
   0x1   :  { %14 = vsyncpa [#allocation3 + $0x1], 0  ;;  %s1260_s24 = smov 0   ;;  %s1262_s25 = smov 0  }
   0x2   :  { %s1264_s26 = smov 0   ;;  %s1266_s27 = smov 0  }
   0x3 LB: > { %s1281_s28 = sadd.s32 4294967295, %s1215_s27   ;;  %s926_s29 = sadd.s32 4294967294, %s1215_s27   ;;  %s1215_s27 = sphi %s1266_s27, %s1487_s27   ;;  %s1211_s26 = sphi %s1264_s26, %s1486_s26   ;;  %s1207_s25 = sphi %s1262_s25, %s1485_s25   ;;  %s1203_s24 = sphi %s1260_s24, %s1484_s24  }
   0x4   : > { %s1285_s30 = sadd.s32 1, %s1215_s27   ;;  %s179_s8 = sadd.s32 1, %s1211_s26 }
   0x5   : > { %s176_s9 = ssub.s32 %s1215_s27, %s1285_s30  ;;  %p189_p0 = scmp.ne.s32.totalorder %s1211_s26, %s1207_s25 }
   0x6   : > { %p177_p1 = scmp.eq.s32.totalorder %s176_s9, 0  ;;  %p190_p2 = scmp.eq.s32.totalorder %s1281_s28, 1 }
   0x7   : > { %p195_p3 = scmp.ne.s32.totalorder %s1207_s25, %s1203_s24  ;;  %p196_p4 = scmp.eq.s32.totalorder %s926_s29, 1 }
   0x8   : > { %s1296_s10 = scalar_select %p177_p1, %s1211_s26, %s179_s8  }
   0x9   : > { %p1298_p5 = por %p190_p2, %p189_p0  ;;  %p1302_p6 = por %p196_p4, %p195_p3 }
   0xa   : > { %p929_p7 = scmp.ge.s32.totalorder %s1215_s27, 1  ;;  %p241_p8 = scmp.lt.s32.totalorder %s1215_s27, 3 }
   0xc   : > { %p242_p9 = pnand %p929_p7, %p241_p8 }
   0xd   : > { %v1135_v0 = vld [vmem:[%s1475_s1] sm:$0xff] (!%p242_p9)   ;;  %s931_s15 = sshll.u32 (!%p242_p9), %s1281_s28, 4  ;;  %v1136_v1 = vld [vmem:[%s1475_s1 + $0x8] sm:$0xff] (!%p242_p9)   ;;  %v1139_v4 = vld [vmem:[%s1477_s3 + $0x10] sm:$0xff] (!%p242_p9)   ;;  %vm328_vm0 = vcmask (!%p242_p9), 261120   ;;  %s270_s16 = sand.u32 (!%p242_p9), 1, %s1207_s25  }
   0xe   : > { %245 = sbr.rel (%p242_p9) target bundleno = 728 (0x2d8), region = 48  ;;  %p274_p10 = scmp.lt.s32.totalorder (!%p242_p9), %s931_s15, 31  ;;  %1010 = vmatprep.subr.bf16.mxu0 (!%p242_p9), %v1135_v0  ;;  %v1137_v2 = vld [vmem:[%s1477_s3] sm:$0xff] (!%p242_p9)   ;;  %v1138_v3 = vld [vmem:[%s1477_s3 + $0x8] sm:$0xff] (!%p242_p9)   ;;  %v1140_v14 = vld [vmem:[%s1477_s3 + $0x18] sm:$0xff] (!%p242_p9)  }
   0xf   : > { %1011 = vmatpush3.bf16.msra.mxu0 (!%p242_p9), %v1135_v0  ;;  %1030 = vmatprep.subr.bf16.mxu1 (!%p242_p9), %v1137_v2  ;;  %v1141_v18 = vld [vmem:[%s1477_s3 + $0x20] sm:$0xff] (!%p242_p9)   ;;  %v1142_v22 = vld [vmem:[%s1477_s3 + $0x28] sm:$0xff] (!%p242_p9)   ;;  %v1143_v32 = vld [vmem:[%s1477_s3 + $0x30] sm:$0xff] (!%p242_p9)   ;;  %s930_s17 = sshll.u32 (!%p242_p9), %s270_s16, 7  ;;  %s967_s21 = sshll.u32 (!%p242_p9), %s1281_s28, 11 }
  0x10   : > { %1012 = vmatprep.subr.bf16.mxu0 (!%p242_p9), %v1136_v1  ;;  %1031 = vmatpush3.bf16.msra.mxu1 (!%p242_p9), %v1137_v2  ;;  %v1144_v33 = vld [vmem:[%s1477_s3 + $0x38] sm:$0xff] (!%p242_p9)   ;;  %v1145_v34 = vld [vmem:[%s1479_s5] sm:$0xff] (!%p242_p9)   ;;  %v1146_v35 = vld [vmem:[%s1479_s5 + $0x8] sm:$0xff] (!%p242_p9)   ;;  %s1404_s20 = scalar_lea.vmem (!%p242_p9), [#allocation2], %s930_s17  ;;  %s1424_s9 = scalar_lea.hbm (!%p242_p9), %s1481_s7, %s967_s21 }
  0x11   : > { %1032 = vmatprep.subr.bf16.mxu1 (!%p242_p9), %v1138_v3  ;;  %v1147_v36 = vld [vmem:[%s1479_s5 + $0x10] sm:$0xff] (!%p242_p9)   ;;  %v1148_v37 = vld [vmem:[%s1479_s5 + $0x18] sm:$0xff] (!%p242_p9)   ;;  %v1149_v38 = vld [vmem:[%s1479_s5 + $0x20] sm:$0xff] (!%p242_p9)   ;;  %s1433_s28 = scalar_lea.sflag (!%p242_p9), [#allocation3], %s270_s16  ;;  %s1217_s13 = smov (!%p242_p9), [#allocation2]  }
  0x12   : > { %v1150_v39 = vld [vmem:[%s1479_s5 + $0x28] sm:$0xff] (!%p242_p9)   ;;  %v933_v40 = vld [vmem:[%s1476_s2] ss:$0 sm:$0xff] (!%p242_p9)  ;;  %s1157_s14 = sshll.u32 (!%p242_p9), %s1217_s13, 4  ;;  %s1158_s14 = int_to_ptr.vmem [resolvable:$false] %s1157_s14 }
  0x13   : > { %1013 = vmatpush3.bf16.msra.mxu0 (!%p242_p9), %v1136_v1 }
  0x14   : > { %1033 = vmatpush3.bf16.msra.mxu1 (!%p242_p9), %v1138_v3  ;;  %1062 = vmatprep.subr.bf16.mxu0 (!%p242_p9), %v1145_v34 }
  0x15   : > { %s1489_s15 = smov (!%p274_p10, %s931_s15), 31  ;;  %1034 = vmatprep.subr.bf16.mxu1 %v1139_v4 }
  0x16   : > { %s932_s22 = sshll.u32 %s1489_s15, 3  ;;  %s1159_s15 = scalar_lea.vmem %s1158_s14, 4096 }
  0x17   : > { %s1324_s8 = scalar_lea.vmem %s1474_s0, %s932_s22  ;;  %s864_s22 = sshll.u32 %s1404_s20, 4  ;;  %s1426_s22 = int_to_ptr.vmem [resolvable:$true] %s864_s22 }
  0x18   : > { %v281_v5 = vld [vmem:[%s1324_s8] sm:$0xff]  ;;  %v282_v6 = vld [vmem:[%s1324_s8 + $0x8] sm:$0xff]  ;;  %v283_v7 = vld [vmem:[%s1324_s8 + $0x10] sm:$0xff]  ;;  %1035 = vmatpush3.bf16.msra.mxu1 %v1139_v4  ;;  %p1160_p0 = scmp.lt.s32.totalorder %s1426_s22, %s1158_s14 }
  0x19   : > { %v297_v8 = vpack.c.bf16 %v282_v6, %v281_v5  ;;  %v284_v9 = vld [vmem:[%s1324_s8 + $0x18] sm:$0xff]  ;;  %v285_v10 = vld [vmem:[%s1324_s8 + $0x20] sm:$0xff]  ;;  %v286_v11 = vld [vmem:[%s1324_s8 + $0x28] sm:$0xff]  ;;  %1036 = vmatprep.subr.bf16.mxu1 %v1140_v14 }
  0x1a   : > { %v298_v12 = vpack.c.bf16 %v284_v9, %v283_v7  ;;  %v299_v13 = vpack.c.bf16 %v286_v11, %v285_v10  ;;  %v287_v15 = vld [vmem:[%s1324_s8 + $0x30] sm:$0xff]  ;;  %v288_v16 = vld [vmem:[%s1324_s8 + $0x38] sm:$0xff]  ;;  %v289_v17 = vld [vmem:[%s1324_s8 + $0x40] sm:$0xff] }
  0x1b   : > { %1014 = vmatprep.mubr.msk.bf16.mxu0 %vm328_vm0, %v297_v8  ;;  %v290_v19 = vld [vmem:[%s1324_s8 + $0x48] sm:$0xff]  ;;  %v300_v20 = vpack.c.bf16 %v288_v16, %v287_v15  ;;  %v291_v23 = vld [vmem:[%s1324_s8 + $0x50] sm:$0xff]  ;;  %v292_v24 = vld [vmem:[%s1324_s8 + $0x58] sm:$0xff] }
  0x1c   : > { %1015 = vmatmul.mubr.msk.bf16.vlgmr.msra.gmra.mrb[0].mxu0 %vm328_vm0, %v298_v12  ;;  %v301_v21 = vpack.c.bf16 %v290_v19, %v289_v17  ;;  %1037 = vmatpush3.bf16.msra.mxu1 %v1140_v14  ;;  %v293_v25 = vld [vmem:[%s1324_s8 + $0x60] sm:$0xff]  ;;  %v294_v26 = vld [vmem:[%s1324_s8 + $0x68] sm:$0xff]  ;;  %v302_v27 = vpack.c.bf16 %v292_v24, %v291_v23  ;;  %v295_v29 = vld [vmem:[%s1324_s8 + $0x70] sm:$0xff] }
  0x1d   : > { %1018 = vmatprep.mubr.msk.bf16.mxu0 %vm328_vm0, %v299_v13  ;;  %1038 = vmatprep.subr.bf16.mxu1 %v1141_v18  ;;  %v303_v28 = vpack.c.bf16 %v294_v26, %v293_v25  ;;  %v296_v30 = vld [vmem:[%s1324_s8 + $0x78] sm:$0xff]  ;;  %s1153_s8 = scalar_lea.vmem %s1426_s22, 2048 }
  0x1e   : > { %v304_v31 = vpack.c.bf16 %v296_v30, %v295_v29  ;;  %1063 = vmatpush3.bf16.msra.mxu0 %v1145_v34  ;;  %v1152_v34 = vld [vmem:[%s1479_s5 + $0x38] sm:$0xff]   ;;  %p1154_p11 = scmp.ne.s32.totalorder %s1426_s22, %s1153_s8  ;;  %p1161_p1 = scmp.lt.s32.totalorder %s1159_s15, %s1153_s8 }
  0x1f   : > { %1064 = vmatprep.subr.bf16.mxu0 %v1146_v35 }
  0x20   : > { %1039 = vmatpush3.bf16.msra.mxu1 %v1141_v18  ;;  %p1155_p12 = pnand %p1154_p11, %p1298_p5  ;;  %p1162_p2 = por %p1161_p1, %p1160_p0 }
  0x21   : > { %1040 = vmatprep.subr.bf16.mxu1 %v1142_v22 }
  0x22   : > { %1065 = vmatpush3.bf16.msra.mxu0 %v1146_v35  ;;  %v944_v35 = vld [vmem:[%s1478_s4] ss:$0 sm:$0xff]  ;;  %p1156_p13 = pneg %p1155_p12 }
  0x23   : > { %1066 = vmatprep.subr.bf16.mxu0 %v1147_v36 }
  0x24   : > { %1019 = vmatmul.mubr.msk.bf16.gmra.mrb[4].mxu0 %vm328_vm0, %v300_v20  ;;  %1041 = vmatpush3.bf16.msra.mxu1 %v1142_v22  ;;  %p1163_p3 = pnand %p1162_p2, %p1156_p13 }
  0x25   : > { %1022 = vmatprep.mubr.msk.bf16.mxu0 %vm328_vm0, %v301_v21  ;;  %1042 = vmatprep.subr.bf16.mxu1 %v1143_v32 }
  0x26   : > { %1067 = vmatpush3.bf16.msra.mxu0 %v1147_v36 }
  0x27   : > { %1068 = vmatprep.subr.bf16.mxu0 %v1148_v37 }
  0x28   : > { %1043 = vmatpush3.bf16.msra.mxu1 %v1143_v32 }
  0x29   : > { %1044 = vmatprep.subr.bf16.mxu1 %v1144_v33 }
  0x2a   : > { %1069 = vmatpush3.bf16.msra.mxu0 %v1148_v37 }
  0x2b   : > { %1070 = vmatprep.subr.bf16.mxu0 %v1149_v38 }
  0x2c   : > { %1023 = vmatmul.mubr.msk.bf16.gmra.mrb[8].mxu0 %vm328_vm0, %v302_v27  ;;  %1045 = vmatpush3.bf16.msra.mxu1 %v1144_v33  ;;  %v1151_v33 = vld [vmem:[%s1479_s5 + $0x30] sm:$0xff]  }
  0x2d   : > { %1026 = vmatprep.mubr.msk.bf16.mxu0 %vm328_vm0, %v303_v28 }
  0x2e   : > { %1071 = vmatpush3.bf16.msra.mxu0 %v1149_v38 }
  0x2f   : > { %1072 = vmatprep.subr.bf16.mxu0 %v1150_v39 }
  0x32   : > { %1073 = vmatpush3.bf16.msra.mxu0 %v1150_v39 }
  0x33   : > { %1074 = vmatprep.subr.bf16.mxu0 %v1151_v33 }
  0x34   : > { %1027 = vmatmul.mubr.msk.bf16.gmra.mrb[12].mxu0 %vm328_vm0, %v304_v31 }
  0x36   : > { %1075 = vmatpush3.bf16.msra.mxu0 %v1151_v33 }
  0x37   : > { %1076 = vmatprep.subr.bf16.mxu0 %v1152_v34 }
  0x3a   : > { %1077 = vmatpush3.bf16.msra.mxu0 %v1152_v34 }
  0xef   : > { %v1016_v41 = vpop.f32.mrb[0].mxu0 }
  0xf0   : > { %v396_v42 = vadd.f32 %v1016_v41, %v933_v40  ;;  %v387_v43 = vpop.f32.mrb[1].mxu0 }
  0xf1   : > { %v388_v44 = vadd.f32 %v933_v40, %v387_v43  ;;  %v1017_v45 = vpop.f32.mrb[2].mxu0 }
  0xf2   : > { %v399_v46 = vadd.f32 %v1017_v45, %v933_v40  ;;  %v390_v47 = vpop.f32.mrb[3].mxu0  ;;  %v452_v49 = vmax.f32 %v396_v42, 0.0 }
  0xf3   : > { %v391_v48 = vadd.f32 %v933_v40, %v390_v47  ;;  %v450_v51 = vmax.f32 %v388_v44, 0.0 }
  0xf4   : > { %v453_v50 = vmax.f32 %v399_v46, 0.0 }
  0xf5   : > { %v451_v52 = vmax.f32 %v391_v48, 0.0 }
  0xf6   : > { %v467_v53 = vpack.c.bf16 %v453_v50, %v452_v49 }
  0xf7   : > { %v1020_v54 = vpop.f32.mrb[4].mxu0  ;;  %v466_v55 = vpack.c.bf16 %v451_v52, %v450_v51 }
  0xf8   : > { %v412_v56 = vadd.f32 %v1020_v54, %v933_v40  ;;  %v403_v57 = vpop.f32.mrb[5].mxu0 }
  0xf9   : > { %v404_v58 = vadd.f32 %v933_v40, %v403_v57  ;;  %v1021_v59 = vpop.f32.mrb[6].mxu0  ;;  %1046 = vmatprep.mubr.bf16.mxu1 %v466_v55 }
  0xfa   : > { %v415_v60 = vadd.f32 %v1021_v59, %v933_v40  ;;  %v406_v61 = vpop.f32.mrb[7].mxu0  ;;  %1047 = vmatmul.mubr.bf16.vlgmr.msra.gmra.mrb[0].mxu1 %v467_v53  ;;  %v456_v63 = vmax.f32 %v412_v56, 0.0 }
  0xfb   : > { %v407_v62 = vadd.f32 %v933_v40, %v406_v61  ;;  %v454_v1 = vmax.f32 %v404_v58, 0.0 }
  0xfc   : > { %v457_v0 = vmax.f32 %v415_v60, 0.0 }
  0xfd   : > { %v455_v2 = vmax.f32 %v407_v62, 0.0 }
  0xfe   : > { %v469_v3 = vpack.c.bf16 %v457_v0, %v456_v63 }
  0xff   : > { %v468_v4 = vpack.c.bf16 %v455_v2, %v454_v1  ;;  %v1024_v5 = vpop.f32.mrb[8].mxu0 }
 0x100   : > { %v428_v6 = vadd.f32 %v1024_v5, %v933_v40  ;;  %v419_v7 = vpop.f32.mrb[9].mxu0 }
 0x101   : > { %v420_v8 = vadd.f32 %v933_v40, %v419_v7  ;;  %v1025_v9 = vpop.f32.mrb[10].mxu0  ;;  %1050 = vmatprep.mubr.bf16.mxu1 %v468_v4 }
 0x102   : > { %v431_v10 = vadd.f32 %v1025_v9, %v933_v40  ;;  %v422_v11 = vpop.f32.mrb[11].mxu0  ;;  %1051 = vmatmul.mubr.bf16.gmra.mrb[4].mxu1 %v469_v3  ;;  %v460_v13 = vmax.f32 %v428_v6, 0.0 }
 0x103   : > { %v423_v12 = vadd.f32 %v933_v40, %v422_v11  ;;  %v458_v15 = vmax.f32 %v420_v8, 0.0 }
 0x104   : > { %v461_v14 = vmax.f32 %v431_v10, 0.0 }
 0x105   : > { %v459_v16 = vmax.f32 %v423_v12, 0.0 }
 0x106   : > { %v471_v17 = vpack.c.bf16 %v461_v14, %v460_v13 }
 0x107   : > { %v470_v18 = vpack.c.bf16 %v459_v16, %v458_v15  ;;  %v1028_v19 = vpop.f32.mrb[12].mxu0 }
 0x108   : > { %v444_v20 = vadd.f32 %v1028_v19, %v933_v40  ;;  %v435_v21 = vpop.f32.mrb[13].mxu0 }
 0x109   : > { %v436_v22 = vadd.f32 %v933_v40, %v435_v21  ;;  %v1029_v23 = vpop.f32.mrb[14].mxu0  ;;  %1054 = vmatprep.mubr.bf16.mxu1 %v470_v18 }
 0x10a   : > { %v447_v24 = vadd.f32 %v1029_v23, %v933_v40  ;;  %v438_v25 = vpop.f32.mrb[15].mxu0  ;;  %1055 = vmatmul.mubr.bf16.gmra.mrb[8].mxu1 %v471_v17  ;;  %v464_v27 = vmax.f32 %v444_v20, 0.0 }
 0x10b   : > { %v439_v26 = vadd.f32 %v933_v40, %v438_v25  ;;  %v462_v29 = vmax.f32 %v436_v22, 0.0 }
 0x10c   : > { %v465_v28 = vmax.f32 %v447_v24, 0.0 }
 0x10d   : > { %v463_v30 = vmax.f32 %v439_v26, 0.0 }
 0x10e   : > { %v473_v31 = vpack.c.bf16 %v465_v28, %v464_v27  ;;  %v953_v28 = vld [vmem:[%s1480_s6] ss:$0 sm:$0xff] }
 0x10f   : > { %v472_v32 = vpack.c.bf16 %v463_v30, %v462_v29 }
 0x111   : > { %1058 = vmatprep.mubr.bf16.mxu1 %v472_v32 }
 0x112   : > { %1059 = vmatmul.mubr.bf16.gmra.mrb[12].mxu1 %v473_v31 }
 0x1cd   : > { %v1048_v36 = vpop.f32.mrb[0].mxu1 }
 0x1ce   : > { %v588_v37 = vadd.f32 %v1048_v36, %v944_v35  ;;  %v579_v38 = vpop.f32.mrb[1].mxu1 }
 0x1cf   : > { %v580_v39 = vadd.f32 %v944_v35, %v579_v38  ;;  %v1049_v40 = vpop.f32.mrb[2].mxu1 }
 0x1d0   : > { %v591_v41 = vadd.f32 %v1049_v40, %v944_v35  ;;  %v582_v42 = vpop.f32.mrb[3].mxu1  ;;  %v644_v44 = vmax.f32 %v588_v37, 0.0 }
 0x1d1   : > { %v583_v43 = vadd.f32 %v944_v35, %v582_v42  ;;  %v642_v46 = vmax.f32 %v580_v39, 0.0 }
 0x1d2   : > { %v645_v45 = vmax.f32 %v591_v41, 0.0 }
 0x1d3   : > { %v643_v47 = vmax.f32 %v583_v43, 0.0 }
 0x1d4   : > { %v659_v48 = vpack.c.bf16 %v645_v45, %v644_v44 }
 0x1d5   : > { %v658_v49 = vpack.c.bf16 %v643_v47, %v642_v46  ;;  %v1052_v50 = vpop.f32.mrb[4].mxu1 }
 0x1d6   : > { %v604_v51 = vadd.f32 %v1052_v50, %v944_v35  ;;  %v595_v52 = vpop.f32.mrb[5].mxu1 }
 0x1d7   : > { %v596_v53 = vadd.f32 %v944_v35, %v595_v52  ;;  %v1053_v54 = vpop.f32.mrb[6].mxu1  ;;  %1078 = vmatprep.mubr.bf16.mxu0 %v658_v49 }
 0x1d8   : > { %v607_v55 = vadd.f32 %v1053_v54, %v944_v35  ;;  %v598_v56 = vpop.f32.mrb[7].mxu1  ;;  %1079 = vmatmul.mubr.bf16.vlgmr.msra.gmra.mrb[16].mxu0 %v659_v48  ;;  %v648_v58 = vmax.f32 %v604_v51, 0.0 }
 0x1d9   : > { %v599_v57 = vadd.f32 %v944_v35, %v598_v56  ;;  %v646_v60 = vmax.f32 %v596_v53, 0.0 }
 0x1da   : > { %v649_v59 = vmax.f32 %v607_v55, 0.0 }
 0x1db   : > { %v647_v61 = vmax.f32 %v599_v57, 0.0 }
 0x1dc   : > { %v661_v62 = vpack.c.bf16 %v649_v59, %v648_v58 }
 0x1dd   : > { %v660_v63 = vpack.c.bf16 %v647_v61, %v646_v60  ;;  %v1056_v0 = vpop.f32.mrb[8].mxu1 }
 0x1de   : > { %v620_v1 = vadd.f32 %v1056_v0, %v944_v35  ;;  %v611_v2 = vpop.f32.mrb[9].mxu1 }
 0x1df   : > { %v612_v3 = vadd.f32 %v944_v35, %v611_v2  ;;  %v1057_v4 = vpop.f32.mrb[10].mxu1  ;;  %1082 = vmatprep.mubr.bf16.mxu0 %v660_v63 }
 0x1e0   : > { %v623_v5 = vadd.f32 %v1057_v4, %v944_v35  ;;  %v614_v6 = vpop.f32.mrb[11].mxu1  ;;  %1083 = vmatmul.mubr.bf16.gmra.mrb[20].mxu0 %v661_v62  ;;  %v652_v8 = vmax.f32 %v620_v1, 0.0 }
 0x1e1   : > { %v615_v7 = vadd.f32 %v944_v35, %v614_v6  ;;  %v650_v10 = vmax.f32 %v612_v3, 0.0 }
 0x1e2   : > { %v653_v9 = vmax.f32 %v623_v5, 0.0 }
 0x1e3   : > { %v651_v11 = vmax.f32 %v615_v7, 0.0 }
 0x1e4   : > { %v663_v12 = vpack.c.bf16 %v653_v9, %v652_v8 }
 0x1e5   : > { %v662_v13 = vpack.c.bf16 %v651_v11, %v650_v10  ;;  %v1060_v14 = vpop.f32.mrb[12].mxu1 }
 0x1e6   : > { %v636_v15 = vadd.f32 %v1060_v14, %v944_v35  ;;  %v627_v16 = vpop.f32.mrb[13].mxu1 }
 0x1e7   : > { %v628_v17 = vadd.f32 %v944_v35, %v627_v16  ;;  %v1061_v18 = vpop.f32.mrb[14].mxu1  ;;  %1086 = vmatprep.mubr.bf16.mxu0 %v662_v13 }
 0x1e8   : > { %v639_v19 = vadd.f32 %v1061_v18, %v944_v35  ;;  %v630_v20 = vpop.f32.mrb[15].mxu1  ;;  %1087 = vmatmul.mubr.bf16.gmra.mrb[24].mxu0 %v663_v12  ;;  %v656_v22 = vmax.f32 %v636_v15, 0.0 }
 0x1e9   : > { %v631_v21 = vadd.f32 %v944_v35, %v630_v20  ;;  %v654_v24 = vmax.f32 %v628_v17, 0.0 }
 0x1ea   : > { %v657_v23 = vmax.f32 %v639_v19, 0.0 }
 0x1eb   : > { %v655_v25 = vmax.f32 %v631_v21, 0.0 }
 0x1ec   : > { %v665_v26 = vpack.c.bf16 %v657_v23, %v656_v22 }
 0x1ed   : > { %v664_v27 = vpack.c.bf16 %v655_v25, %v654_v24 }
 0x1ef   : > { %1090 = vmatprep.mubr.bf16.mxu0 %v664_v27 }
 0x1f0   : > { %1091 = vmatmul.mubr.bf16.gmra.mrb[28].mxu0 %v665_v26 }
 0x2ab   : > { %v1080_v29 = vpop.f32.mrb[16].mxu0 }
 0x2ac   : > { %v780_v30 = vadd.f32 %v1080_v29, %v953_v28  ;;  %v771_v31 = vpop.f32.mrb[17].mxu0 }
 0x2ad   : > { %v772_v32 = vadd.f32 %v953_v28, %v771_v31  ;;  %v1081_v33 = vpop.f32.mrb[18].mxu0 }
 0x2ae   : > { %836 = vst [vmem:[%s1404_s20 + $0x10] sm:$0xff] %v780_v30  ;;  %v783_v34 = vadd.f32 %v1081_v33, %v953_v28  ;;  %v774_v35 = vpop.f32.mrb[19].mxu0 }
 0x2af   : > { %834 = vst [vmem:[%s1404_s20] sm:$0xff] %v772_v32  ;;  %v775_v36 = vadd.f32 %v953_v28, %v774_v35 }
 0x2b0   : > { %837 = vst [vmem:[%s1404_s20 + $0x18] sm:$0xff] %v783_v34 }
 0x2b1   : > { %835 = vst [vmem:[%s1404_s20 + $0x8] sm:$0xff] %v775_v36 }
 0x2b3   : > { %v1084_v37 = vpop.f32.mrb[20].mxu0 }
 0x2b4   : > { %v796_v38 = vadd.f32 %v1084_v37, %v953_v28  ;;  %v787_v39 = vpop.f32.mrb[21].mxu0 }
 0x2b5   : > { %v788_v40 = vadd.f32 %v953_v28, %v787_v39  ;;  %v1085_v41 = vpop.f32.mrb[22].mxu0 }
 0x2b6   : > { %840 = vst [vmem:[%s1404_s20 + $0x30] sm:$0xff] %v796_v38  ;;  %v799_v42 = vadd.f32 %v1085_v41, %v953_v28  ;;  %v790_v43 = vpop.f32.mrb[23].mxu0 }
 0x2b7   : > { %838 = vst [vmem:[%s1404_s20 + $0x20] sm:$0xff] %v788_v40  ;;  %v791_v44 = vadd.f32 %v953_v28, %v790_v43 }
 0x2b8   : > { %841 = vst [vmem:[%s1404_s20 + $0x38] sm:$0xff] %v799_v42 }
 0x2b9   : > { %839 = vst [vmem:[%s1404_s20 + $0x28] sm:$0xff] %v791_v44 }
 0x2bb   : > { %v1088_v45 = vpop.f32.mrb[24].mxu0 }
 0x2bc   : > { %v812_v46 = vadd.f32 %v1088_v45, %v953_v28  ;;  %v803_v47 = vpop.f32.mrb[25].mxu0 }
 0x2bd   : > { %v804_v48 = vadd.f32 %v953_v28, %v803_v47  ;;  %v1089_v49 = vpop.f32.mrb[26].mxu0 }
 0x2be   : > { %844 = vst [vmem:[%s1404_s20 + $0x50] sm:$0xff] %v812_v46  ;;  %v815_v50 = vadd.f32 %v1089_v49, %v953_v28  ;;  %v806_v51 = vpop.f32.mrb[27].mxu0 }
 0x2bf   : > { %842 = vst [vmem:[%s1404_s20 + $0x40] sm:$0xff] %v804_v48  ;;  %v807_v52 = vadd.f32 %v953_v28, %v806_v51 }
 0x2c0   : > { %845 = vst [vmem:[%s1404_s20 + $0x58] sm:$0xff] %v815_v50 }
 0x2c1   : > { %843 = vst [vmem:[%s1404_s20 + $0x48] sm:$0xff] %v807_v52 }
 0x2c3   : > { %v1092_v53 = vpop.f32.mrb[28].mxu0 }
 0x2c4   : > { %v828_v54 = vadd.f32 %v1092_v53, %v953_v28  ;;  %v819_v55 = vpop.f32.mrb[29].mxu0 }
 0x2c5   : > { %v820_v56 = vadd.f32 %v953_v28, %v819_v55  ;;  %v1093_v57 = vpop.f32.mrb[30].mxu0 }
 0x2c6   : > { %848 = vst [vmem:[%s1404_s20 + $0x70] sm:$0xff] %v828_v54  ;;  %v831_v58 = vadd.f32 %v1093_v57, %v953_v28  ;;  %v822_v59 = vpop.f32.mrb[31].mxu0 }
 0x2c7   : > { %846 = vst [vmem:[%s1404_s20 + $0x60] sm:$0xff] %v820_v56  ;;  %v823_v60 = vadd.f32 %v953_v28, %v822_v59 }
 0x2c8   : > { %849 = vst [vmem:[%s1404_s20 + $0x78] sm:$0xff] %v831_v58 }
 0x2c9   : > { %847 = vst [vmem:[%s1404_s20 + $0x68] sm:$0xff] %v823_v60 }
 0x2ca   : > { %1166 = shalt.err (!%p1163_p3)
}
 0x2cb   : > { %s1167_s16 = scalar_lea.hbm %s1424_s9, 2048  ;;  %s1171_s19 = scalar_lea.hbm %s1481_s7, 4096 }
 0x2cc   : > { %p1168_p4 = scmp.ne.s32.totalorder %s1424_s9, %s1167_s16  ;;  %p1172_p9 = scmp.lt.u32.totalorder %s1424_s9, %s1481_s7 }
 0x2cd   : > { %p1173_p10 = scmp.lt.u32.totalorder %s1171_s19, %s1167_s16  ;;  %p1175_p12 = scmp.lt.u32.totalorder %s1167_s16, %s1424_s9 }
 0x2ce   : > { %p1169_p7 = pnand %p1168_p4, %p1298_p5 }
 0x2cf   : > { %p1174_p11 = por %p1173_p10, %p1172_p9 }
 0x2d0   : > { %p1170_p8 = pneg %p1169_p7 }
 0x2d1   : > { %p1176_p13 = por %p1175_p12, %p1174_p11 }
 0x2d3   : > { %p1177_p0 = pnand %p1176_p13, %p1170_p8 }
 0x2d5   : > { %1180 = shalt.err (!%p1177_p0)
}
 0x2d6   : > { %s1218_s23 = smov 128   ;;  %s1219_s29 = smov 8  }
 0x2d7   : > { %1094 = dma.vmem_to_hbm [thread:$0]  (%p1298_p5), %s1426_s22, 2048, %s1424_s9, %s1433_s28, %s1218_s23, %s1218_s23, %s1219_s29  }
 0x2d8 PF: > { %p1100_p1 = scmp.ge.s32.totalorder %s1215_s27, 2  ;;  %s879_s8 = sand.u32 1, %s1203_s24  }
 0x2d9   : > { %s880_s13 = scalar_lea.sflag [#allocation3], %s879_s8 }
 0x2da   : > { %p1097_p2 = pnand %p1100_p1, %p1302_p6 }
 0x2dc   : > { %1198 = dma.done.wait (!%p1097_p2), %s880_s13, 2048  }
 0x2dd   : > { %1200 = vsyncadd (!%p1097_p2), %s880_s13, 4294965248  ;;  %p17_p3 = scmp.ge.s32.totalorder %s1285_s30, 4   ;;  %s1484_s24 = smov %s1207_s25 }
 0x2de   : > { %s1485_s25 = smov %s1211_s26  ;;  %s1486_s26 = smov %s1296_s10 }
 0x2df   : > { %s1487_s27 = smov %s1285_s30  ;;  %19 = sbr.rel (!%p17_p3) target bundleno = 3 (0x3), region = 83 }
 0x2e6   :  { %885 = vsyncpa [#allocation3], 1 }
 0x2e7   :  { %887 = vsyncpa [#allocation3 + $0x1], 1 }

// kernel: tpu_custom_call.1
= control target key start
LH: loop header
LB: loop body
LE: loop exit
PB: predicated region body
PF: predicated region fallthrough
CT: control target
= control target key end

     0   :  { %12 = vsyncpa [#allocation3], 0  ;;  %s1474_s0 = inlined_call_operand.vmem [shape: f32[256,32], index: 0, kind: input, shape index: {}]   ;;  %s1475_s1 = inlined_call_operand.vmem [shape: bf16[32,128], index: 1, kind: input, shape index: {}]   ;;  %s1476_s2 = inlined_call_operand.vmem [shape: f32[1,128], index: 2, kind: input, shape index: {}]   ;;  %s1477_s3 = inlined_call_operand.vmem [shape: bf16[128,128], index: 3, kind: input, shape index: {}]   ;;  %s1478_s4 = inlined_call_operand.vmem [shape: f32[1,128], index: 4, kind: input, shape index: {}]   ;;  %s1479_s5 = inlined_call_operand.vmem [shape: bf16[128,128], index: 5, kind: input, shape index: {}]   ;;  %s1480_s6 = inlined_call_operand.vmem [shape: f32[1,128], index: 6, kind: input, shape index: {}]   ;;  %s1481_s7 = inlined_call_operand.hbm [shape: f32[256,128], index: 7, kind: output, shape index: {}]  }
   0x1   :  { %14 = vsyncpa [#allocation3 + $0x1], 0  ;;  %s1260_s24 = smov 0   ;;  %s1262_s25 = smov 0  }
   0x2   :  { %s1264_s26 = smov 0   ;;  %s1266_s27 = smov 0  }
   0x3 LB: > { %s1281_s28 = sadd.s32 4294967295, %s1215_s27   ;;  %s926_s29 = sadd.s32 4294967294, %s1215_s27   ;;  %s1215_s27 = sphi %s1266_s27, %s1487_s27   ;;  %s1211_s26 = sphi %s1264_s26, %s1486_s26   ;;  %s1207_s25 = sphi %s1262_s25, %s1485_s25   ;;  %s1203_s24 = sphi %s1260_s24, %s1484_s24  }
   0x4   : > { %s1285_s30 = sadd.s32 1, %s1215_s27   ;;  %s179_s8 = sadd.s32 1, %s1211_s26 }
   0x5   : > { %s176_s9 = ssub.s32 %s1215_s27, %s1285_s30  ;;  %p189_p0 = scmp.ne.s32.totalorder %s1211_s26, %s1207_s25 }
   0x6   : > { %p177_p1 = scmp.eq.s32.totalorder %s176_s9, 0  ;;  %p190_p2 = scmp.eq.s32.totalorder %s1281_s28, 1 }
   0x7   : > { %p195_p3 = scmp.ne.s32.totalorder %s1207_s25, %s1203_s24  ;;  %p196_p4 = scmp.eq.s32.totalorder %s926_s29, 1 }
   0x8   : > { %s1296_s10 = scalar_select %p177_p1, %s1211_s26, %s179_s8  }
   0x9   : > { %p1298_p5 = por %p190_p2, %p189_p0  ;;  %p1302_p6 = por %p196_p4, %p195_p3 }
   0xa   : > { %p929_p7 = scmp.ge.s32.totalorder %s1215_s27, 1  ;;  %p241_p8 = scmp.lt.s32.totalorder %s1215_s27, 3 }
   0xc   : > { %p242_p9 = pnand %p929_p7, %p241_p8 }
   0xd   : > { %v1135_v0 = vld [vmem:[%s1475_s1] sm:$0xff] (!%p242_p9)   ;;  %s931_s15 = sshll.u32 (!%p242_p9), %s1281_s28, 4  ;;  %v1136_v1 = vld [vmem:[%s1475_s1 + $0x8] sm:$0xff] (!%p242_p9)   ;;  %v1139_v4 = vld [vmem:[%s1477_s3 + $0x10] sm:$0xff] (!%p242_p9)   ;;  %vm328_vm0 = vcmask (!%p242_p9), 261120   ;;  %s270_s16 = sand.u32 (!%p242_p9), 1, %s1207_s25  }
   0xe   : > { %245 = sbr.rel (%p242_p9) target bundleno = 728 (0x2d8), region = 48  ;;  %p274_p10 = scmp.lt.s32.totalorder (!%p242_p9), %s931_s15, 31  ;;  %1010 = vmatprep.subr.bf16.mxu0 (!%p242_p9), %v1135_v0  ;;  %v1137_v2 = vld [vmem:[%s1477_s3] sm:$0xff] (!%p242_p9)   ;;  %v1138_v3 = vld [vmem:[%s1477_s3 + $0x8] sm:$0xff] (!%p242_p9)   ;;  %v1140_v14 = vld [vmem:[%s1477_s3 + $0x18] sm:$0xff] (!%p242_p9)  }
   0xf   : > { %1011 = vmatpush3.bf16.msra.mxu0 (!%p242_p9), %v1135_v0  ;;  %1030 = vmatprep.subr.bf16.mxu1 (!%p242_p9), %v1137_v2  ;;  %v1141_v18 = vld [vmem:[%s1477_s3 + $0x20] sm:$0xff] (!%p242_p9)   ;;  %v1142_v22 = vld [vmem:[%s1477_s3 + $0x28] sm:$0xff] (!%p242_p9)   ;;  %v1143_v32 = vld [vmem:[%s1477_s3 + $0x30] sm:$0xff] (!%p242_p9)   ;;  %s930_s17 = sshll.u32 (!%p242_p9), %s270_s16, 7  ;;  %s967_s21 = sshll.u32 (!%p242_p9), %s1281_s28, 11 }
  0x10   : > { %1012 = vmatprep.subr.bf16.mxu0 (!%p242_p9), %v1136_v1  ;;  %1031 = vmatpush3.bf16.msra.mxu1 (!%p242_p9), %v1137_v2  ;;  %v1144_v33 = vld [vmem:[%s1477_s3 + $0x38] sm:$0xff] (!%p242_p9)   ;;  %v1145_v34 = vld [vmem:[%s1479_s5] sm:$0xff] (!%p242_p9)   ;;  %v1146_v35 = vld [vmem:[%s1479_s5 + $0x8] sm:$0xff] (!%p242_p9)   ;;  %s1404_s20 = scalar_lea.vmem (!%p242_p9), [#allocation2], %s930_s17  ;;  %s1424_s9 = scalar_lea.hbm (!%p242_p9), %s1481_s7, %s967_s21 }
  0x11   : > { %1032 = vmatprep.subr.bf16.mxu1 (!%p242_p9), %v1138_v3  ;;  %v1147_v36 = vld [vmem:[%s1479_s5 + $0x10] sm:$0xff] (!%p242_p9)   ;;  %v1148_v37 = vld [vmem:[%s1479_s5 + $0x18] sm:$0xff] (!%p242_p9)   ;;  %v1149_v38 = vld [vmem:[%s1479_s5 + $0x20] sm:$0xff] (!%p242_p9)   ;;  %s1433_s28 = scalar_lea.sflag (!%p242_p9), [#allocation3], %s270_s16  ;;  %s1217_s13 = smov (!%p242_p9), [#allocation2]  }
  0x12   : > { %v1150_v39 = vld [vmem:[%s1479_s5 + $0x28] sm:$0xff] (!%p242_p9)   ;;  %v933_v40 = vld [vmem:[%s1476_s2] ss:$0 sm:$0xff] (!%p242_p9)  ;;  %s1157_s14 = sshll.u32 (!%p242_p9), %s1217_s13, 4  ;;  %s1158_s14 = int_to_ptr.vmem [resolvable:$false] %s1157_s14 }
  0x13   : > { %1013 = vmatpush3.bf16.msra.mxu0 (!%p242_p9), %v1136_v1 }
  0x14   : > { %1033 = vmatpush3.bf16.msra.mxu1 (!%p242_p9), %v1138_v3  ;;  %1062 = vmatprep.subr.bf16.mxu0 (!%p242_p9), %v1145_v34 }
  0x15   : > { %s1489_s15 = smov (!%p274_p10, %s931_s15), 31  ;;  %1034 = vmatprep.subr.bf16.mxu1 %v1139_v4 }
  0x16   : > { %s932_s22 = sshll.u32 %s1489_s15, 3  ;;  %s1159_s15 = scalar_lea.vmem %s1158_s14, 4096 }
  0x17   : > { %s1324_s8 = scalar_lea.vmem %s1474_s0, %s932_s22  ;;  %s864_s22 = sshll.u32 %s1404_s20, 4  ;;  %s1426_s22 = int_to_ptr.vmem [resolvable:$true] %s864_s22 }
  0x18   : > { %v281_v5 = vld [vmem:[%s1324_s8] sm:$0xff]  ;;  %v282_v6 = vld [vmem:[%s1324_s8 + $0x8] sm:$0xff]  ;;  %v283_v7 = vld [vmem:[%s1324_s8 + $0x10] sm:$0xff]  ;;  %1035 = vmatpush3.bf16.msra.mxu1 %v1139_v4  ;;  %p1160_p0 = scmp.lt.s32.totalorder %s1426_s22, %s1158_s14 }
  0x19   : > { %v297_v8 = vpack.c.bf16 %v282_v6, %v281_v5  ;;  %v284_v9 = vld [vmem:[%s1324_s8 + $0x18] sm:$0xff]  ;;  %v285_v10 = vld [vmem:[%s1324_s8 + $0x20] sm:$0xff]  ;;  %v286_v11 = vld [vmem:[%s1324_s8 + $0x28] sm:$0xff]  ;;  %1036 = vmatprep.subr.bf16.mxu1 %v1140_v14 }
  0x1a   : > { %v298_v12 = vpack.c.bf16 %v284_v9, %v283_v7  ;;  %v299_v13 = vpack.c.bf16 %v286_v11, %v285_v10  ;;  %v287_v15 = vld [vmem:[%s1324_s8 + $0x30] sm:$0xff]  ;;  %v288_v16 = vld [vmem:[%s1324_s8 + $0x38] sm:$0xff]  ;;  %v289_v17 = vld [vmem:[%s1324_s8 + $0x40] sm:$0xff] }
  0x1b   : > { %1014 = vmatprep.mubr.msk.bf16.mxu0 %vm328_vm0, %v297_v8  ;;  %v290_v19 = vld [vmem:[%s1324_s8 + $0x48] sm:$0xff]  ;;  %v300_v20 = vpack.c.bf16 %v288_v16, %v287_v15  ;;  %v291_v23 = vld [vmem:[%s1324_s8 + $0x50] sm:$0xff]  ;;  %v292_v24 = vld [vmem:[%s1324_s8 + $0x58] sm:$0xff] }
  0x1c   : > { %1015 = vmatmul.mubr.msk.bf16.vlgmr.msra.gmra.mrb[0].mxu0 %vm328_vm0, %v298_v12  ;;  %v301_v21 = vpack.c.bf16 %v290_v19, %v289_v17  ;;  %1037 = vmatpush3.bf16.msra.mxu1 %v1140_v14  ;;  %v293_v25 = vld [vmem:[%s1324_s8 + $0x60] sm:$0xff]  ;;  %v294_v26 = vld [vmem:[%s1324_s8 + $0x68] sm:$0xff]  ;;  %v302_v27 = vpack.c.bf16 %v292_v24, %v291_v23  ;;  %v295_v29 = vld [vmem:[%s1324_s8 + $0x70] sm:$0xff] }
  0x1d   : > { %1018 = vmatprep.mubr.msk.bf16.mxu0 %vm328_vm0, %v299_v13  ;;  %1038 = vmatprep.subr.bf16.mxu1 %v1141_v18  ;;  %v303_v28 = vpack.c.bf16 %v294_v26, %v293_v25  ;;  %v296_v30 = vld [vmem:[%s1324_s8 + $0x78] sm:$0xff]  ;;  %s1153_s8 = scalar_lea.vmem %s1426_s22, 2048 }
  0x1e   : > { %v304_v31 = vpack.c.bf16 %v296_v30, %v295_v29  ;;  %1063 = vmatpush3.bf16.msra.mxu0 %v1145_v34  ;;  %v1152_v34 = vld [vmem:[%s1479_s5 + $0x38] sm:$0xff]   ;;  %p1154_p11 = scmp.ne.s32.totalorder %s1426_s22, %s1153_s8  ;;  %p1161_p1 = scmp.lt.s32.totalorder %s1159_s15, %s1153_s8 }
  0x1f   : > { %1064 = vmatprep.subr.bf16.mxu0 %v1146_v35 }
  0x20   : > { %1039 = vmatpush3.bf16.msra.mxu1 %v1141_v18  ;;  %p1155_p12 = pnand %p1154_p11, %p1298_p5  ;;  %p1162_p2 = por %p1161_p1, %p1160_p0 }
  0x21   : > { %1040 = vmatprep.subr.bf16.mxu1 %v1142_v22 }
  0x22   : > { %1065 = vmatpush3.bf16.msra.mxu0 %v1146_v35  ;;  %v944_v35 = vld [vmem:[%s1478_s4] ss:$0 sm:$0xff]  ;;  %p1156_p13 = pneg %p1155_p12 }
  0x23   : > { %1066 = vmatprep.subr.bf16.mxu0 %v1147_v36 }
  0x24   : > { %1019 = vmatmul.mubr.msk.bf16.gmra.mrb[4].mxu0 %vm328_vm0, %v300_v20  ;;  %1041 = vmatpush3.bf16.msra.mxu1 %v1142_v22  ;;  %p1163_p3 = pnand %p1162_p2, %p1156_p13 }
  0x25   : > { %1022 = vmatprep.mubr.msk.bf16.mxu0 %vm328_vm0, %v301_v21  ;;  %1042 = vmatprep.subr.bf16.mxu1 %v1143_v32 }
  0x26   : > { %1067 = vmatpush3.bf16.msra.mxu0 %v1147_v36 }
  0x27   : > { %1068 = vmatprep.subr.bf16.mxu0 %v1148_v37 }
  0x28   : > { %1043 = vmatpush3.bf16.msra.mxu1 %v1143_v32 }
  0x29   : > { %1044 = vmatprep.subr.bf16.mxu1 %v1144_v33 }
  0x2a   : > { %1069 = vmatpush3.bf16.msra.mxu0 %v1148_v37 }
  0x2b   : > { %1070 = vmatprep.subr.bf16.mxu0 %v1149_v38 }
  0x2c   : > { %1023 = vmatmul.mubr.msk.bf16.gmra.mrb[8].mxu0 %vm328_vm0, %v302_v27  ;;  %1045 = vmatpush3.bf16.msra.mxu1 %v1144_v33  ;;  %v1151_v33 = vld [vmem:[%s1479_s5 + $0x30] sm:$0xff]  }
  0x2d   : > { %1026 = vmatprep.mubr.msk.bf16.mxu0 %vm328_vm0, %v303_v28 }
  0x2e   : > { %1071 = vmatpush3.bf16.msra.mxu0 %v1149_v38 }
  0x2f   : > { %1072 = vmatprep.subr.bf16.mxu0 %v1150_v39 }
  0x32   : > { %1073 = vmatpush3.bf16.msra.mxu0 %v1150_v39 }
  0x33   : > { %1074 = vmatprep.subr.bf16.mxu0 %v1151_v33 }
  0x34   : > { %1027 = vmatmul.mubr.msk.bf16.gmra.mrb[12].mxu0 %vm328_vm0, %v304_v31 }
  0x36   : > { %1075 = vmatpush3.bf16.msra.mxu0 %v1151_v33 }
  0x37   : > { %1076 = vmatprep.subr.bf16.mxu0 %v1152_v34 }
  0x3a   : > { %1077 = vmatpush3.bf16.msra.mxu0 %v1152_v34 }
  0xef   : > { %v1016_v41 = vpop.f32.mrb[0].mxu0 }
  0xf0   : > { %v396_v42 = vadd.f32 %v1016_v41, %v933_v40  ;;  %v387_v43 = vpop.f32.mrb[1].mxu0 }
  0xf1   : > { %v388_v44 = vadd.f32 %v933_v40, %v387_v43  ;;  %v1017_v45 = vpop.f32.mrb[2].mxu0 }
  0xf2   : > { %v399_v46 = vadd.f32 %v1017_v45, %v933_v40  ;;  %v390_v47 = vpop.f32.mrb[3].mxu0  ;;  %v452_v49 = vmax.f32 %v396_v42, 0.0 }
  0xf3   : > { %v391_v48 = vadd.f32 %v933_v40, %v390_v47  ;;  %v450_v51 = vmax.f32 %v388_v44, 0.0 }
  0xf4   : > { %v453_v50 = vmax.f32 %v399_v46, 0.0 }
  0xf5   : > { %v451_v52 = vmax.f32 %v391_v48, 0.0 }
  0xf6   : > { %v467_v53 = vpack.c.bf16 %v453_v50, %v452_v49 }
  0xf7   : > { %v1020_v54 = vpop.f32.mrb[4].mxu0  ;;  %v466_v55 = vpack.c.bf16 %v451_v52, %v450_v51 }
  0xf8   : > { %v412_v56 = vadd.f32 %v1020_v54, %v933_v40  ;;  %v403_v57 = vpop.f32.mrb[5].mxu0 }
  0xf9   : > { %v404_v58 = vadd.f32 %v933_v40, %v403_v57  ;;  %v1021_v59 = vpop.f32.mrb[6].mxu0  ;;  %1046 = vmatprep.mubr.bf16.mxu1 %v466_v55 }
  0xfa   : > { %v415_v60 = vadd.f32 %v1021_v59, %v933_v40  ;;  %v406_v61 = vpop.f32.mrb[7].mxu0  ;;  %1047 = vmatmul.mubr.bf16.vlgmr.msra.gmra.mrb[0].mxu1 %v467_v53  ;;  %v456_v63 = vmax.f32 %v412_v56, 0.0 }
  0xfb   : > { %v407_v62 = vadd.f32 %v933_v40, %v406_v61  ;;  %v454_v1 = vmax.f32 %v404_v58, 0.0 }
  0xfc   : > { %v457_v0 = vmax.f32 %v415_v60, 0.0 }
  0xfd   : > { %v455_v2 = vmax.f32 %v407_v62, 0.0 }
  0xfe   : > { %v469_v3 = vpack.c.bf16 %v457_v0, %v456_v63 }
  0xff   : > { %v468_v4 = vpack.c.bf16 %v455_v2, %v454_v1  ;;  %v1024_v5 = vpop.f32.mrb[8].mxu0 }
 0x100   : > { %v428_v6 = vadd.f32 %v1024_v5, %v933_v40  ;;  %v419_v7 = vpop.f32.mrb[9].mxu0 }
 0x101   : > { %v420_v8 = vadd.f32 %v933_v40, %v419_v7  ;;  %v1025_v9 = vpop.f32.mrb[10].mxu0  ;;  %1050 = vmatprep.mubr.bf16.mxu1 %v468_v4 }
 0x102   : > { %v431_v10 = vadd.f32 %v1025_v9, %v933_v40  ;;  %v422_v11 = vpop.f32.mrb[11].mxu0  ;;  %1051 = vmatmul.mubr.bf16.gmra.mrb[4].mxu1 %v469_v3  ;;  %v460_v13 = vmax.f32 %v428_v6, 0.0 }
 0x103   : > { %v423_v12 = vadd.f32 %v933_v40, %v422_v11  ;;  %v458_v15 = vmax.f32 %v420_v8, 0.0 }
 0x104   : > { %v461_v14 = vmax.f32 %v431_v10, 0.0 }
 0x105   : > { %v459_v16 = vmax.f32 %v423_v12, 0.0 }
 0x106   : > { %v471_v17 = vpack.c.bf16 %v461_v14, %v460_v13 }
 0x107   : > { %v470_v18 = vpack.c.bf16 %v459_v16, %v458_v15  ;;  %v1028_v19 = vpop.f32.mrb[12].mxu0 }
 0x108   : > { %v444_v20 = vadd.f32 %v1028_v19, %v933_v40  ;;  %v435_v21 = vpop.f32.mrb[13].mxu0 }
 0x109   : > { %v436_v22 = vadd.f32 %v933_v40, %v435_v21  ;;  %v1029_v23 = vpop.f32.mrb[14].mxu0  ;;  %1054 = vmatprep.mubr.bf16.mxu1 %v470_v18 }
 0x10a   : > { %v447_v24 = vadd.f32 %v1029_v23, %v933_v40  ;;  %v438_v25 = vpop.f32.mrb[15].mxu0  ;;  %1055 = vmatmul.mubr.bf16.gmra.mrb[8].mxu1 %v471_v17  ;;  %v464_v27 = vmax.f32 %v444_v20, 0.0 }
 0x10b   : > { %v439_v26 = vadd.f32 %v933_v40, %v438_v25  ;;  %v462_v29 = vmax.f32 %v436_v22, 0.0 }
 0x10c   : > { %v465_v28 = vmax.f32 %v447_v24, 0.0 }
 0x10d   : > { %v463_v30 = vmax.f32 %v439_v26, 0.0 }
 0x10e   : > { %v473_v31 = vpack.c.bf16 %v465_v28, %v464_v27  ;;  %v953_v28 = vld [vmem:[%s1480_s6] ss:$0 sm:$0xff] }
 0x10f   : > { %v472_v32 = vpack.c.bf16 %v463_v30, %v462_v29 }
 0x111   : > { %1058 = vmatprep.mubr.bf16.mxu1 %v472_v32 }
 0x112   : > { %1059 = vmatmul.mubr.bf16.gmra.mrb[12].mxu1 %v473_v31 }
 0x1cd   : > { %v1048_v36 = vpop.f32.mrb[0].mxu1 }
 0x1ce   : > { %v588_v37 = vadd.f32 %v1048_v36, %v944_v35  ;;  %v579_v38 = vpop.f32.mrb[1].mxu1 }
 0x1cf   : > { %v580_v39 = vadd.f32 %v944_v35, %v579_v38  ;;  %v1049_v40 = vpop.f32.mrb[2].mxu1 }
 0x1d0   : > { %v591_v41 = vadd.f32 %v1049_v40, %v944_v35  ;;  %v582_v42 = vpop.f32.mrb[3].mxu1  ;;  %v644_v44 = vmax.f32 %v588_v37, 0.0 }
 0x1d1   : > { %v583_v43 = vadd.f32 %v944_v35, %v582_v42  ;;  %v642_v46 = vmax.f32 %v580_v39, 0.0 }
 0x1d2   : > { %v645_v45 = vmax.f32 %v591_v41, 0.0 }
 0x1d3   : > { %v643_v47 = vmax.f32 %v583_v43, 0.0 }
 0x1d4   : > { %v659_v48 = vpack.c.bf16 %v645_v45, %v644_v44 }
 0x1d5   : > { %v658_v49 = vpack.c.bf16 %v643_v47, %v642_v46  ;;  %v1052_v50 = vpop.f32.mrb[4].mxu1 }
 0x1d6   : > { %v604_v51 = vadd.f32 %v1052_v50, %v944_v35  ;;  %v595_v52 = vpop.f32.mrb[5].mxu1 }
 0x1d7   : > { %v596_v53 = vadd.f32 %v944_v35, %v595_v52  ;;  %v1053_v54 = vpop.f32.mrb[6].mxu1  ;;  %1078 = vmatprep.mubr.bf16.mxu0 %v658_v49 }
 0x1d8   : > { %v607_v55 = vadd.f32 %v1053_v54, %v944_v35  ;;  %v598_v56 = vpop.f32.mrb[7].mxu1  ;;  %1079 = vmatmul.mubr.bf16.vlgmr.msra.gmra.mrb[16].mxu0 %v659_v48  ;;  %v648_v58 = vmax.f32 %v604_v51, 0.0 }
 0x1d9   : > { %v599_v57 = vadd.f32 %v944_v35, %v598_v56  ;;  %v646_v60 = vmax.f32 %v596_v53, 0.0 }
 0x1da   : > { %v649_v59 = vmax.f32 %v607_v55, 0.0 }
 0x1db   : > { %v647_v61 = vmax.f32 %v599_v57, 0.0 }
 0x1dc   : > { %v661_v62 = vpack.c.bf16 %v649_v59, %v648_v58 }
 0x1dd   : > { %v660_v63 = vpack.c.bf16 %v647_v61, %v646_v60  ;;  %v1056_v0 = vpop.f32.mrb[8].mxu1 }
 0x1de   : > { %v620_v1 = vadd.f32 %v1056_v0, %v944_v35  ;;  %v611_v2 = vpop.f32.mrb[9].mxu1 }
 0x1df   : > { %v612_v3 = vadd.f32 %v944_v35, %v611_v2  ;;  %v1057_v4 = vpop.f32.mrb[10].mxu1  ;;  %1082 = vmatprep.mubr.bf16.mxu0 %v660_v63 }
 0x1e0   : > { %v623_v5 = vadd.f32 %v1057_v4, %v944_v35  ;;  %v614_v6 = vpop.f32.mrb[11].mxu1  ;;  %1083 = vmatmul.mubr.bf16.gmra.mrb[20].mxu0 %v661_v62  ;;  %v652_v8 = vmax.f32 %v620_v1, 0.0 }
 0x1e1   : > { %v615_v7 = vadd.f32 %v944_v35, %v614_v6  ;;  %v650_v10 = vmax.f32 %v612_v3, 0.0 }
 0x1e2   : > { %v653_v9 = vmax.f32 %v623_v5, 0.0 }
 0x1e3   : > { %v651_v11 = vmax.f32 %v615_v7, 0.0 }
 0x1e4   : > { %v663_v12 = vpack.c.bf16 %v653_v9, %v652_v8 }
 0x1e5   : > { %v662_v13 = vpack.c.bf16 %v651_v11, %v650_v10  ;;  %v1060_v14 = vpop.f32.mrb[12].mxu1 }
 0x1e6   : > { %v636_v15 = vadd.f32 %v1060_v14, %v944_v35  ;;  %v627_v16 = vpop.f32.mrb[13].mxu1 }
 0x1e7   : > { %v628_v17 = vadd.f32 %v944_v35, %v627_v16  ;;  %v1061_v18 = vpop.f32.mrb[14].mxu1  ;;  %1086 = vmatprep.mubr.bf16.mxu0 %v662_v13 }
 0x1e8   : > { %v639_v19 = vadd.f32 %v1061_v18, %v944_v35  ;;  %v630_v20 = vpop.f32.mrb[15].mxu1  ;;  %1087 = vmatmul.mubr.bf16.gmra.mrb[24].mxu0 %v663_v12  ;;  %v656_v22 = vmax.f32 %v636_v15, 0.0 }
 0x1e9   : > { %v631_v21 = vadd.f32 %v944_v35, %v630_v20  ;;  %v654_v24 = vmax.f32 %v628_v17, 0.0 }
 0x1ea   : > { %v657_v23 = vmax.f32 %v639_v19, 0.0 }
 0x1eb   : > { %v655_v25 = vmax.f32 %v631_v21, 0.0 }
 0x1ec   : > { %v665_v26 = vpack.c.bf16 %v657_v23, %v656_v22 }
 0x1ed   : > { %v664_v27 = vpack.c.bf16 %v655_v25, %v654_v24 }
 0x1ef   : > { %1090 = vmatprep.mubr.bf16.mxu0 %v664_v27 }
 0x1f0   : > { %1091 = vmatmul.mubr.bf16.gmra.mrb[28].mxu0 %v665_v26 }
 0x2ab   : > { %v1080_v29 = vpop.f32.mrb[16].mxu0 }
 0x2ac   : > { %v780_v30 = vadd.f32 %v1080_v29, %v953_v28  ;;  %v771_v31 = vpop.f32.mrb[17].mxu0 }
 0x2ad   : > { %v772_v32 = vadd.f32 %v953_v28, %v771_v31  ;;  %v1081_v33 = vpop.f32.mrb[18].mxu0 }
 0x2ae   : > { %836 = vst [vmem:[%s1404_s20 + $0x10] sm:$0xff] %v780_v30  ;;  %v783_v34 = vadd.f32 %v1081_v33, %v953_v28  ;;  %v774_v35 = vpop.f32.mrb[19].mxu0 }
 0x2af   : > { %834 = vst [vmem:[%s1404_s20] sm:$0xff] %v772_v32  ;;  %v775_v36 = vadd.f32 %v953_v28, %v774_v35 }
 0x2b0   : > { %837 = vst [vmem:[%s1404_s20 + $0x18] sm:$0xff] %v783_v34 }
 0x2b1   : > { %835 = vst [vmem:[%s1404_s20 + $0x8] sm:$0xff] %v775_v36 }
 0x2b3   : > { %v1084_v37 = vpop.f32.mrb[20].mxu0 }
 0x2b4   : > { %v796_v38 = vadd.f32 %v1084_v37, %v953_v28  ;;  %v787_v39 = vpop.f32.mrb[21].mxu0 }
 0x2b5   : > { %v788_v40 = vadd.f32 %v953_v28, %v787_v39  ;;  %v1085_v41 = vpop.f32.mrb[22].mxu0 }
 0x2b6   : > { %840 = vst [vmem:[%s1404_s20 + $0x30] sm:$0xff] %v796_v38  ;;  %v799_v42 = vadd.f32 %v1085_v41, %v953_v28  ;;  %v790_v43 = vpop.f32.mrb[23].mxu0 }
 0x2b7   : > { %838 = vst [vmem:[%s1404_s20 + $0x20] sm:$0xff] %v788_v40  ;;  %v791_v44 = vadd.f32 %v953_v28, %v790_v43 }
 0x2b8   : > { %841 = vst [vmem:[%s1404_s20 + $0x38] sm:$0xff] %v799_v42 }
 0x2b9   : > { %839 = vst [vmem:[%s1404_s20 + $0x28] sm:$0xff] %v791_v44 }
 0x2bb   : > { %v1088_v45 = vpop.f32.mrb[24].mxu0 }
 0x2bc   : > { %v812_v46 = vadd.f32 %v1088_v45, %v953_v28  ;;  %v803_v47 = vpop.f32.mrb[25].mxu0 }
 0x2bd   : > { %v804_v48 = vadd.f32 %v953_v28, %v803_v47  ;;  %v1089_v49 = vpop.f32.mrb[26].mxu0 }
 0x2be   : > { %844 = vst [vmem:[%s1404_s20 + $0x50] sm:$0xff] %v812_v46  ;;  %v815_v50 = vadd.f32 %v1089_v49, %v953_v28  ;;  %v806_v51 = vpop.f32.mrb[27].mxu0 }
 0x2bf   : > { %842 = vst [vmem:[%s1404_s20 + $0x40] sm:$0xff] %v804_v48  ;;  %v807_v52 = vadd.f32 %v953_v28, %v806_v51 }
 0x2c0   : > { %845 = vst [vmem:[%s1404_s20 + $0x58] sm:$0xff] %v815_v50 }
 0x2c1   : > { %843 = vst [vmem:[%s1404_s20 + $0x48] sm:$0xff] %v807_v52 }
 0x2c3   : > { %v1092_v53 = vpop.f32.mrb[28].mxu0 }
 0x2c4   : > { %v828_v54 = vadd.f32 %v1092_v53, %v953_v28  ;;  %v819_v55 = vpop.f32.mrb[29].mxu0 }
 0x2c5   : > { %v820_v56 = vadd.f32 %v953_v28, %v819_v55  ;;  %v1093_v57 = vpop.f32.mrb[30].mxu0 }
 0x2c6   : > { %848 = vst [vmem:[%s1404_s20 + $0x70] sm:$0xff] %v828_v54  ;;  %v831_v58 = vadd.f32 %v1093_v57, %v953_v28  ;;  %v822_v59 = vpop.f32.mrb[31].mxu0 }
 0x2c7   : > { %846 = vst [vmem:[%s1404_s20 + $0x60] sm:$0xff] %v820_v56  ;;  %v823_v60 = vadd.f32 %v953_v28, %v822_v59 }
 0x2c8   : > { %849 = vst [vmem:[%s1404_s20 + $0x78] sm:$0xff] %v831_v58 }
 0x2c9   : > { %847 = vst [vmem:[%s1404_s20 + $0x68] sm:$0xff] %v823_v60 }
 0x2ca   : > { %1166 = shalt.err (!%p1163_p3)
}
 0x2cb   : > { %s1167_s16 = scalar_lea.hbm %s1424_s9, 2048  ;;  %s1171_s19 = scalar_lea.hbm %s1481_s7, 4096 }
 0x2cc   : > { %p1168_p4 = scmp.ne.s32.totalorder %s1424_s9, %s1167_s16  ;;  %p1172_p9 = scmp.lt.u32.totalorder %s1424_s9, %s1481_s7 }
 0x2cd   : > { %p1173_p10 = scmp.lt.u32.totalorder %s1171_s19, %s1167_s16  ;;  %p1175_p12 = scmp.lt.u32.totalorder %s1167_s16, %s1424_s9 }
 0x2ce   : > { %p1169_p7 = pnand %p1168_p4, %p1298_p5 }
 0x2cf   : > { %p1174_p11 = por %p1173_p10, %p1172_p9 }
 0x2d0   : > { %p1170_p8 = pneg %p1169_p7 }
 0x2d1   : > { %p1176_p13 = por %p1175_p12, %p1174_p11 }
 0x2d3   : > { %p1177_p0 = pnand %p1176_p13, %p1170_p8 }
 0x2d5   : > { %1180 = shalt.err (!%p1177_p0)
}
 0x2d6   : > { %s1218_s23 = smov 128   ;;  %s1219_s29 = smov 8  }
 0x2d7   : > { %1094 = dma.vmem_to_hbm [thread:$0]  (%p1298_p5), %s1426_s22, 2048, %s1424_s9, %s1433_s28, %s1218_s23, %s1218_s23, %s1219_s29  }
 0x2d8 PF: > { %p1100_p1 = scmp.ge.s32.totalorder %s1215_s27, 2  ;;  %s879_s8 = sand.u32 1, %s1203_s24  }
 0x2d9   : > { %s880_s13 = scalar_lea.sflag [#allocation3], %s879_s8 }
 0x2da   : > { %p1097_p2 = pnand %p1100_p1, %p1302_p6 }
 0x2dc   : > { %1198 = dma.done.wait (!%p1097_p2), %s880_s13, 2048  }
 0x2dd   : > { %1200 = vsyncadd (!%p1097_p2), %s880_s13, 4294965248  ;;  %p17_p3 = scmp.ge.s32.totalorder %s1285_s30, 4   ;;  %s1484_s24 = smov %s1207_s25 }
 0x2de   : > { %s1485_s25 = smov %s1211_s26  ;;  %s1486_s26 = smov %s1296_s10 }
 0x2df   : > { %s1487_s27 = smov %s1285_s30  ;;  %19 = sbr.rel (!%p17_p3) target bundleno = 3 (0x3), region = 83 }
 0x2e6   :  { %885 = vsyncpa [#allocation3], 1 }
 0x2e7   :  { %887 = vsyncpa [#allocation3 + $0x1], 1 }

</bundles_post_ra>
